<compile_context>
chip_gen: v5e
topology: v5e:2x2
jax: 0.10.0
libtpu: 0.0.40
codegen_flags: <defaults>
</compile_context>

<pallas_src>
import functools

import jax
import jax.numpy as jnp
from jax.experimental import pallas as pl
from jax.experimental.pallas import tpu as pltpu

EPS = 1e-5  # nn.BatchNorm1d default eps


def _linear_block_kernel(x_ref, w_ref, p_ref, *rest, add_residual):
    """One LinearBlock (Linear -> ReLU -> BatchNorm1d), optionally + residual.

    Grid = (n_tiles, k_tiles).
      x_ref : (B, bk)  f32 activation block at K index k (batch resident).
      w_ref : (bk, bn) bf16 weight tile at (k, n) - streamed / double-buffered.
      p_ref : (3, bn)  f32 packed [bias; gamma; beta] at column tile n.
      acc_ref: (B, bn) f32 VMEM accumulator (persists across the K axis).
    """
    if add_residual:
        res_ref, o_ref, acc_ref = rest
    else:
        res_ref = None
        o_ref, acc_ref = rest

    k = pl.program_id(1)

    @pl.when(k == 0)
    def _init():
        acc_ref[...] = jnp.zeros_like(acc_ref)

    # MXU: bf16 x bf16 -> f32 accumulation.
    x_bf16 = x_ref[...].astype(jnp.bfloat16)
    acc_ref[...] += jnp.dot(x_bf16, w_ref[...],
                            preferred_element_type=jnp.float32)

    @pl.when(k == pl.num_programs(1) - 1)
    def _finalize():
        p = p_ref[...]                       # (3, bn) f32
        bias = p[0:1, :]
        gamma = p[1:2, :]
        beta = p[2:3, :]

        # Linear bias + ReLU (f32 elementwise on the VPU).
        z = jnp.maximum(acc_ref[...] + bias, 0.0)

        # One-pass batch statistics (biased variance), folded scale/shift.
        inv_b = 1.0 / z.shape[0]
        mean = jnp.sum(z, axis=0, keepdims=True) * inv_b
        ex2 = jnp.sum(z * z, axis=0, keepdims=True) * inv_b
        var = jnp.maximum(ex2 - mean * mean, 0.0)
        scale = gamma * jax.lax.rsqrt(var + EPS)
        shift = beta - mean * scale
        out = z * scale + shift

        if add_residual:
            out = out + res_ref[...].astype(jnp.float32)

        o_ref[...] = out.astype(o_ref.dtype)


def _pick_block(dim, requested):
    if requested is not None:
        return requested
    return 256 if dim % 256 == 0 else 128


def linear_block(x, w_bf16, packed, residual=None, *,
                 block_n=None, block_k=None, out_dtype=None):
    """x: (B, D_in) f32.  w_bf16: (D_in, D_out) bf16 (pre-transposed).
    packed: (3, D_out) f32 = [bias; gamma; beta].  residual: optional (B, D_out)."""
    B, D_in = x.shape
    d_in_w, D_out = w_bf16.shape
    assert d_in_w == D_in
    assert B % 8 == 0, "batch must be a multiple of 8 (sublane width)"
    bn = _pick_block(D_out, block_n)
    bk = _pick_block(D_in, block_k)
    assert D_in % bk == 0 and D_out % bn == 0, (
        "embed_dim must be a multiple of 128 (pad the feature axis)")

    grid = (D_out // bn, D_in // bk)
    add_residual = residual is not None

    in_specs = [
        pl.BlockSpec((B, bk), lambda n, k: (0, k)),    # activations
        pl.BlockSpec((bk, bn), lambda n, k: (k, n)),   # streamed weight tile
        pl.BlockSpec((3, bn), lambda n, k: (0, n)),    # packed bias/gamma/beta
    ]
    args = [x, w_bf16, packed]
    if add_residual:
        # Constant over k -> fetched once per n tile by the pipeline.
        in_specs.append(pl.BlockSpec((B, bn), lambda n, k: (0, n)))
        args.append(residual)

    kernel = functools.partial(_linear_block_kernel, add_residual=add_residual)

    return pl.pallas_call(
        kernel,
        out_shape=jax.ShapeDtypeStruct((B, D_out), out_dtype or x.dtype),
        grid=grid,
        in_specs=in_specs,
        out_specs=pl.BlockSpec((B, bn), lambda n, k: (0, n)),
        scratch_shapes=[pltpu.VMEM((B, bn), jnp.float32)],
        compiler_params=pltpu.CompilerParams(
            dimension_semantics=("parallel", "arbitrary"),
            vmem_limit_bytes=32 * 1024 * 1024,
        ),
    )(*args)


@functools.partial(jax.jit, static_argnames=("block_n", "block_k"))
def residual_block(x, params, *, block_n=None, block_k=None):
    """ResidualBlock forward: two LinearBlocks + residual add (fused in 2nd)."""
    h = linear_block(x, params["w1"], params["p1"],
                     block_n=block_n, block_k=block_k, out_dtype=jnp.float32)
    return linear_block(h, params["w2"], params["p2"], residual=x,
                        block_n=block_n, block_k=block_k, out_dtype=x.dtype)


def make_params(key, embed_dim):
    """Deterministic init mirroring nn.Linear (uniform +-1/sqrt(fan_in)),
    BatchNorm1d gamma=1, beta=0.  Weights stored pre-transposed (D_in, D_out)
    in bf16; bias/gamma/beta packed as (3, D) f32."""
    k1, k2, k3, k4 = jax.random.split(key, 4)
    bound = 1.0 / (embed_dim ** 0.5)
    u = lambda k, shape: jax.random.uniform(k, shape, jnp.float32, -bound, bound)
    g = jnp.ones((1, embed_dim), jnp.float32)
    be = jnp.zeros((1, embed_dim), jnp.float32)
    b1 = u(k2, (1, embed_dim))
    b2 = u(k4, (1, embed_dim))
    return {
        "w1": u(k1, (embed_dim, embed_dim)).astype(jnp.bfloat16),
        "w2": u(k3, (embed_dim, embed_dim)).astype(jnp.bfloat16),
        "p1": jnp.concatenate([b1, g, be], axis=0),
        "p2": jnp.concatenate([b2, g, be], axis=0),
    }


def _linear_block_ref(h, w, packed, match_kernel):
    bias, gamma, beta = packed[0:1], packed[1:2], packed[2:3]
    if match_kernel:
        z = jnp.dot(h.astype(jnp.bfloat16), w.astype(jnp.bfloat16),
                    preferred_element_type=jnp.float32) + bias
        z = jnp.maximum(z, 0.0)
        mean = jnp.mean(z, axis=0, keepdims=True)
        ex2 = jnp.mean(z * z, axis=0, keepdims=True)
        var = jnp.maximum(ex2 - mean * mean, 0.0)
    else:
        z = jnp.maximum(h @ w.astype(jnp.float32) + bias, 0.0)
        mean = jnp.mean(z, axis=0, keepdims=True)
        var = jnp.mean((z - mean) ** 2, axis=0, keepdims=True)
    scale = gamma * jax.lax.rsqrt(var + EPS)
    return z * scale + (beta - mean * scale)


def residual_block_ref(x, p, match_kernel):
    """Pure-JAX reference.  match_kernel=True mirrors the kernel math (bf16
    matmul, one-pass stats); False mirrors PyTorch f32 train-mode forward."""
    h = _linear_block_ref(x, p["w1"], p["p1"], match_kernel)
    h = _linear_block_ref(h, p["w2"], p["p2"], match_kernel)
    return h + x


if __name__ == "__main__":
    B, D = 16, 256  # B multiple of 8, D multiple of 128 (lane-dense stores)
    key = jax.random.PRNGKey(0)
    kx, kp = jax.random.split(key)
    x = jax.random.normal(kx, (B, D), jnp.float32)
    params = make_params(kp, D)

    # block 128 -> grid (2, 2) per LinearBlock: exercises the K accumulator
    # loop, the N-parallel axis and the packed-param / residual specs.
    out = residual_block(x, params, block_n=128, block_k=128)
    jax.block_until_ready(out)
    assert out.shape == (B, D)

    ref_faithful = residual_block_ref(x, params, match_kernel=True)
    ref_f32 = residual_block_ref(x, params, match_kernel=False)

    # Strict check against a reference with identical math (validates the
    # Pallas tiling / K accumulation / BatchNorm fusion / residual add).
    assert jnp.allclose(out, ref_faithful, atol=1e-3, rtol=1e-3), \
        "mismatch vs kernel-faithful reference"
    # Loose sanity check against f32 PyTorch-semantics reference (bf16 matmul
    # introduces ~1e-2 level error after BatchNorm amplification).
    assert float(jnp.max(jnp.abs(out - ref_f32))) < 0.2, \
        "mismatch vs f32 semantic reference"

    print("KERNEL_OK")
</pallas_src>

<mosaic_0001>
module attributes {stable_mosaic.version = 11 : i64} {
  func.func @_linear_block_kernel(%arg0: i32, %arg1: i32, %arg2: memref<16x128xf32, #tpu.memory_space<vmem>>, %arg3: memref<128x128xbf16, #tpu.memory_space<vmem>>, %arg4: memref<3x128xf32, #tpu.memory_space<vmem>>, %arg5: memref<16x128xf32, #tpu.memory_space<vmem>>, %arg6: memref<16x128xf32, #tpu.memory_space<vmem>>, %arg7: memref<16x128xf32, #tpu.memory_space<vmem>>) attributes {dimension_semantics = [#tpu.dimension_semantics<parallel>, #tpu.dimension_semantics<arbitrary>], iteration_bounds = array<i64: 2, 2>, scalar_prefetch = 0 : i64, scratch_operands = 1 : i64, tpu.core_type = #tpu.core_type<tc>, window_params = [{transform_indices = @transform_0, window_bounds = array<i64: 16, 128>}, {transform_indices = @transform_1, window_bounds = array<i64: 128, 128>}, {transform_indices = @transform_2, window_bounds = array<i64: 3, 128>}, {transform_indices = @transform_3, window_bounds = array<i64: 16, 128>}, {transform_indices = @transform_4, window_bounds = array<i64: 16, 128>}]} {
    %c0_i32 = arith.constant 0 : i32
    %0 = arith.cmpi eq, %arg1, %c0_i32 : i32
    %1 = arith.extui %0 : i1 to i32
    %c0_i32_0 = arith.constant 0 : i32
    %2 = arith.cmpi ne, %1, %c0_i32_0 : i32
    scf.if %2 {
      %cst_9 = arith.constant 0.000000e+00 : f32
      %13 = vector.broadcast %cst_9 : f32 to vector<16x128xf32>
      %c0_10 = arith.constant 0 : index
      %c0_11 = arith.constant 0 : index
      %14 = vector.load %arg7[%c0_10, %c0_11] : memref<16x128xf32, #tpu.memory_space<vmem>>, vector<16x128xf32>
      tpu.vector_store %arg7[%c0_10, %c0_11], %13 {strides = array<i32>} : memref<16x128xf32, #tpu.memory_space<vmem>>, vector<16x128xf32>,
    } else {
    }
    %c0 = arith.constant 0 : index
    %c0_1 = arith.constant 0 : index
    %3 = vector.load %arg2[%c0, %c0_1] : memref<16x128xf32, #tpu.memory_space<vmem>>, vector<16x128xf32>
    %4 = arith.truncf %3 : vector<16x128xf32> to vector<16x128xbf16>
    %c0_2 = arith.constant 0 : index
    %c0_3 = arith.constant 0 : index
    %5 = vector.load %arg7[%c0_2, %c0_3] : memref<16x128xf32, #tpu.memory_space<vmem>>, vector<16x128xf32>
    %c0_4 = arith.constant 0 : index
    %c0_5 = arith.constant 0 : index
    %6 = vector.load %arg3[%c0_4, %c0_5] : memref<128x128xbf16, #tpu.memory_space<vmem>>, vector<128x128xbf16>
    %cst = arith.constant dense<0.000000e+00> : vector<16x128xf32>
    %7 = tpu.matmul %4, %6, %cst {dimension_numbers = #tpu.dot_dimension_numbers<[1], [0], [0], [1], [0, 0, 1, 1], [], []>} : vector<16x128xbf16>, vector<128x128xbf16>, vector<16x128xf32> -> vector<16x128xf32>
    %8 = arith.addf %5, %7 : vector<16x128xf32>
    %c0_6 = arith.constant 0 : index
    %c0_7 = arith.constant 0 : index
    %9 = vector.load %arg7[%c0_6, %c0_7] : memref<16x128xf32, #tpu.memory_space<vmem>>, vector<16x128xf32>
    tpu.vector_store %arg7[%c0_6, %c0_7], %8 {strides = array<i32>} : memref<16x128xf32, #tpu.memory_space<vmem>>, vector<16x128xf32>,
    %c1_i32 = arith.constant 1 : i32
    %10 = arith.cmpi eq, %arg1, %c1_i32 : i32
    %11 = arith.extui %10 : i1 to i32
    %c0_i32_8 = arith.constant 0 : i32
    %12 = arith.cmpi ne, %11, %c0_i32_8 : i32
    scf.if %12 {
      %c0_9 = arith.constant 0 : index
      %c0_10 = arith.constant 0 : index
      %13 = vector.load %arg4[%c0_9, %c0_10] : memref<3x128xf32, #tpu.memory_space<vmem>>, vector<3x128xf32>
      %14 = vector.extract_strided_slice %13 {offsets = [0, 0], sizes = [1, 128], strides = [1, 1]} : vector<3x128xf32> to vector<1x128xf32>
      %15 = vector.extract_strided_slice %13 {offsets = [1, 0], sizes = [1, 128], strides = [1, 1]} : vector<3x128xf32> to vector<1x128xf32>
      %16 = vector.extract_strided_slice %13 {offsets = [2, 0], sizes = [1, 128], strides = [1, 1]} : vector<3x128xf32> to vector<1x128xf32>
      %c0_11 = arith.constant 0 : index
      %c0_12 = arith.constant 0 : index
      %17 = vector.load %arg7[%c0_11, %c0_12] : memref<16x128xf32, #tpu.memory_space<vmem>>, vector<16x128xf32>
      %18 = vector.broadcast %14 : vector<1x128xf32> to vector<16x128xf32>
      %19 = arith.addf %17, %18 : vector<16x128xf32>
      %cst_13 = arith.constant 0.000000e+00 : f32
      %20 = vector.broadcast %cst_13 : f32 to vector<16x128xf32>
      %21 = arith.maximumf %19, %20 : vector<16x128xf32>
      %cst_14 = arith.constant dense<0.000000e+00> : vector<128xf32>
      %22 = vector.multi_reduction <add>, %21, %cst_14 [0] : vector<16x128xf32> to vector<128xf32>
      %23 = vector.shape_cast %22 : vector<128xf32> to vector<1x128xf32>
      %cst_15 = arith.constant 6.250000e-02 : f32
      %24 = vector.broadcast %cst_15 : f32 to vector<1x128xf32>
      %25 = arith.mulf %23, %24 : vector<1x128xf32>
      %26 = arith.mulf %21, %21 : vector<16x128xf32>
      %cst_16 = arith.constant dense<0.000000e+00> : vector<128xf32>
      %27 = vector.multi_reduction <add>, %26, %cst_16 [0] : vector<16x128xf32> to vector<128xf32>
      %28 = vector.shape_cast %27 : vector<128xf32> to vector<1x128xf32>
      %cst_17 = arith.constant 6.250000e-02 : f32
      %29 = vector.broadcast %cst_17 : f32 to vector<1x128xf32>
      %30 = arith.mulf %28, %29 : vector<1x128xf32>
      %31 = arith.mulf %25, %25 : vector<1x128xf32>
      %32 = arith.subf %30, %31 : vector<1x128xf32>
      %cst_18 = arith.constant 0.000000e+00 : f32
      %33 = vector.broadcast %cst_18 : f32 to vector<1x128xf32>
      %34 = arith.maximumf %32, %33 : vector<1x128xf32>
      %cst_19 = arith.constant 9.99999974E-6 : f32
      %35 = vector.broadcast %cst_19 : f32 to vector<1x128xf32>
      %36 = arith.addf %34, %35 : vector<1x128xf32>
      %37 = math.rsqrt %36 : vector<1x128xf32>
      %38 = arith.mulf %15, %37 : vector<1x128xf32>
      %39 = arith.mulf %25, %38 : vector<1x128xf32>
      %40 = arith.subf %16, %39 : vector<1x128xf32>
      %41 = vector.broadcast %38 : vector<1x128xf32> to vector<16x128xf32>
      %42 = arith.mulf %21, %41 : vector<16x128xf32>
      %43 = vector.broadcast %40 : vector<1x128xf32> to vector<16x128xf32>
      %44 = arith.addf %42, %43 : vector<16x128xf32>
      %c0_20 = arith.constant 0 : index
      %c0_21 = arith.constant 0 : index
      %45 = vector.load %arg5[%c0_20, %c0_21] : memref<16x128xf32, #tpu.memory_space<vmem>>, vector<16x128xf32>
      %46 = arith.addf %44, %45 : vector<16x128xf32>
      %c0_22 = arith.constant 0 : index
      %c0_23 = arith.constant 0 : index
      %47 = vector.load %arg6[%c0_22, %c0_23] : memref<16x128xf32, #tpu.memory_space<vmem>>, vector<16x128xf32>
      tpu.vector_store %arg6[%c0_22, %c0_23], %46 {strides = array<i32>} : memref<16x128xf32, #tpu.memory_space<vmem>>, vector<16x128xf32>,
    } else {
    }
    return
  }
  func.func @transform_0(%arg0: i32, %arg1: i32) -> (i32, i32) {
    %c0_i32 = arith.constant 0 : i32
    %c0_i32_0 = arith.constant 0 : i32
    return %c0_i32, %arg1 : i32, i32
  }
  func.func @transform_1(%arg0: i32, %arg1: i32) -> (i32, i32) {
    %c0_i32 = arith.constant 0 : i32
    return %arg1, %arg0 : i32, i32
  }
  func.func @transform_2(%arg0: i32, %arg1: i32) -> (i32, i32) {
    %c0_i32 = arith.constant 0 : i32
    %c0_i32_0 = arith.constant 0 : i32
    return %c0_i32, %arg0 : i32, i32
  }
  func.func @transform_3(%arg0: i32, %arg1: i32) -> (i32, i32) {
    %c0_i32 = arith.constant 0 : i32
    %c0_i32_0 = arith.constant 0 : i32
    return %c0_i32, %arg0 : i32, i32
  }
  func.func @transform_4(%arg0: i32, %arg1: i32) -> (i32, i32) {
    %c0_i32 = arith.constant 0 : i32
    %c0_i32_0 = arith.constant 0 : i32
    return %c0_i32, %arg0 : i32, i32
  }
}

module attributes {stable_mosaic.version = 11 : i64} {
  func.func @_linear_block_kernel(%arg0: i32, %arg1: i32, %arg2: memref<16x128xf32, #tpu.memory_space<vmem>>, %arg3: memref<128x128xbf16, #tpu.memory_space<vmem>>, %arg4: memref<3x128xf32, #tpu.memory_space<vmem>>, %arg5: memref<16x128xf32, #tpu.memory_space<vmem>>, %arg6: memref<16x128xf32, #tpu.memory_space<vmem>>) attributes {dimension_semantics = [#tpu.dimension_semantics<parallel>, #tpu.dimension_semantics<arbitrary>], iteration_bounds = array<i64: 2, 2>, scalar_prefetch = 0 : i64, scratch_operands = 1 : i64, tpu.core_type = #tpu.core_type<tc>, window_params = [{transform_indices = @transform_0, window_bounds = array<i64: 16, 128>}, {transform_indices = @transform_1, window_bounds = array<i64: 128, 128>}, {transform_indices = @transform_2, window_bounds = array<i64: 3, 128>}, {transform_indices = @transform_3, window_bounds = array<i64: 16, 128>}]} {
    %c0_i32 = arith.constant 0 : i32
    %0 = arith.cmpi eq, %arg1, %c0_i32 : i32
    %1 = arith.extui %0 : i1 to i32
    %c0_i32_0 = arith.constant 0 : i32
    %2 = arith.cmpi ne, %1, %c0_i32_0 : i32
    scf.if %2 {
      %cst_9 = arith.constant 0.000000e+00 : f32
      %13 = vector.broadcast %cst_9 : f32 to vector<16x128xf32>
      %c0_10 = arith.constant 0 : index
      %c0_11 = arith.constant 0 : index
      %14 = vector.load %arg6[%c0_10, %c0_11] : memref<16x128xf32, #tpu.memory_space<vmem>>, vector<16x128xf32>
      tpu.vector_store %arg6[%c0_10, %c0_11], %13 {strides = array<i32>} : memref<16x128xf32, #tpu.memory_space<vmem>>, vector<16x128xf32>,
    } else {
    }
    %c0 = arith.constant 0 : index
    %c0_1 = arith.constant 0 : index
    %3 = vector.load %arg2[%c0, %c0_1] : memref<16x128xf32, #tpu.memory_space<vmem>>, vector<16x128xf32>
    %4 = arith.truncf %3 : vector<16x128xf32> to vector<16x128xbf16>
    %c0_2 = arith.constant 0 : index
    %c0_3 = arith.constant 0 : index
    %5 = vector.load %arg6[%c0_2, %c0_3] : memref<16x128xf32, #tpu.memory_space<vmem>>, vector<16x128xf32>
    %c0_4 = arith.constant 0 : index
    %c0_5 = arith.constant 0 : index
    %6 = vector.load %arg3[%c0_4, %c0_5] : memref<128x128xbf16, #tpu.memory_space<vmem>>, vector<128x128xbf16>
    %cst = arith.constant dense<0.000000e+00> : vector<16x128xf32>
    %7 = tpu.matmul %4, %6, %cst {dimension_numbers = #tpu.dot_dimension_numbers<[1], [0], [0], [1], [0, 0, 1, 1], [], []>} : vector<16x128xbf16>, vector<128x128xbf16>, vector<16x128xf32> -> vector<16x128xf32>
    %8 = arith.addf %5, %7 : vector<16x128xf32>
    %c0_6 = arith.constant 0 : index
    %c0_7 = arith.constant 0 : index
    %9 = vector.load %arg6[%c0_6, %c0_7] : memref<16x128xf32, #tpu.memory_space<vmem>>, vector<16x128xf32>
    tpu.vector_store %arg6[%c0_6, %c0_7], %8 {strides = array<i32>} : memref<16x128xf32, #tpu.memory_space<vmem>>, vector<16x128xf32>,
    %c1_i32 = arith.constant 1 : i32
    %10 = arith.cmpi eq, %arg1, %c1_i32 : i32
    %11 = arith.extui %10 : i1 to i32
    %c0_i32_8 = arith.constant 0 : i32
    %12 = arith.cmpi ne, %11, %c0_i32_8 : i32
    scf.if %12 {
      %c0_9 = arith.constant 0 : index
      %c0_10 = arith.constant 0 : index
      %13 = vector.load %arg4[%c0_9, %c0_10] : memref<3x128xf32, #tpu.memory_space<vmem>>, vector<3x128xf32>
      %14 = vector.extract_strided_slice %13 {offsets = [0, 0], sizes = [1, 128], strides = [1, 1]} : vector<3x128xf32> to vector<1x128xf32>
      %15 = vector.extract_strided_slice %13 {offsets = [1, 0], sizes = [1, 128], strides = [1, 1]} : vector<3x128xf32> to vector<1x128xf32>
      %16 = vector.extract_strided_slice %13 {offsets = [2, 0], sizes = [1, 128], strides = [1, 1]} : vector<3x128xf32> to vector<1x128xf32>
      %c0_11 = arith.constant 0 : index
      %c0_12 = arith.constant 0 : index
      %17 = vector.load %arg6[%c0_11, %c0_12] : memref<16x128xf32, #tpu.memory_space<vmem>>, vector<16x128xf32>
      %18 = vector.broadcast %14 : vector<1x128xf32> to vector<16x128xf32>
      %19 = arith.addf %17, %18 : vector<16x128xf32>
      %cst_13 = arith.constant 0.000000e+00 : f32
      %20 = vector.broadcast %cst_13 : f32 to vector<16x128xf32>
      %21 = arith.maximumf %19, %20 : vector<16x128xf32>
      %cst_14 = arith.constant dense<0.000000e+00> : vector<128xf32>
      %22 = vector.multi_reduction <add>, %21, %cst_14 [0] : vector<16x128xf32> to vector<128xf32>
      %23 = vector.shape_cast %22 : vector<128xf32> to vector<1x128xf32>
      %cst_15 = arith.constant 6.250000e-02 : f32
      %24 = vector.broadcast %cst_15 : f32 to vector<1x128xf32>
      %25 = arith.mulf %23, %24 : vector<1x128xf32>
      %26 = arith.mulf %21, %21 : vector<16x128xf32>
      %cst_16 = arith.constant dense<0.000000e+00> : vector<128xf32>
      %27 = vector.multi_reduction <add>, %26, %cst_16 [0] : vector<16x128xf32> to vector<128xf32>
      %28 = vector.shape_cast %27 : vector<128xf32> to vector<1x128xf32>
      %cst_17 = arith.constant 6.250000e-02 : f32
      %29 = vector.broadcast %cst_17 : f32 to vector<1x128xf32>
      %30 = arith.mulf %28, %29 : vector<1x128xf32>
      %31 = arith.mulf %25, %25 : vector<1x128xf32>
      %32 = arith.subf %30, %31 : vector<1x128xf32>
      %cst_18 = arith.constant 0.000000e+00 : f32
      %33 = vector.broadcast %cst_18 : f32 to vector<1x128xf32>
      %34 = arith.maximumf %32, %33 : vector<1x128xf32>
      %cst_19 = arith.constant 9.99999974E-6 : f32
      %35 = vector.broadcast %cst_19 : f32 to vector<1x128xf32>
      %36 = arith.addf %34, %35 : vector<1x128xf32>
      %37 = math.rsqrt %36 : vector<1x128xf32>
      %38 = arith.mulf %15, %37 : vector<1x128xf32>
      %39 = arith.mulf %25, %38 : vector<1x128xf32>
      %40 = arith.subf %16, %39 : vector<1x128xf32>
      %41 = vector.broadcast %38 : vector<1x128xf32> to vector<16x128xf32>
      %42 = arith.mulf %21, %41 : vector<16x128xf32>
      %43 = vector.broadcast %40 : vector<1x128xf32> to vector<16x128xf32>
      %44 = arith.addf %42, %43 : vector<16x128xf32>
      %c0_20 = arith.constant 0 : index
      %c0_21 = arith.constant 0 : index
      %45 = vector.load %arg5[%c0_20, %c0_21] : memref<16x128xf32, #tpu.memory_space<vmem>>, vector<16x128xf32>
      tpu.vector_store %arg5[%c0_20, %c0_21], %44 {strides = array<i32>} : memref<16x128xf32, #tpu.memory_space<vmem>>, vector<16x128xf32>,
    } else {
    }
    return
  }
  func.func @transform_0(%arg0: i32, %arg1: i32) -> (i32, i32) {
    %c0_i32 = arith.constant 0 : i32
    %c0_i32_0 = arith.constant 0 : i32
    return %c0_i32, %arg1 : i32, i32
  }
  func.func @transform_1(%arg0: i32, %arg1: i32) -> (i32, i32) {
    %c0_i32 = arith.constant 0 : i32
    return %arg1, %arg0 : i32, i32
  }
  func.func @transform_2(%arg0: i32, %arg1: i32) -> (i32, i32) {
    %c0_i32 = arith.constant 0 : i32
    %c0_i32_0 = arith.constant 0 : i32
    return %c0_i32, %arg0 : i32, i32
  }
  func.func @transform_3(%arg0: i32, %arg1: i32) -> (i32, i32) {
    %c0_i32 = arith.constant 0 : i32
    %c0_i32_0 = arith.constant 0 : i32
    return %c0_i32, %arg0 : i32, i32
  }
}

</mosaic_0001>

<bundles_post_ra>
// kernel: residual_block.3
= control target key start
LH: loop header
LB: loop body
LE: loop exit
PB: predicated region body
PF: predicated region fallthrough
CT: control target
= control target key end

     0   :  { %s1433_s0 = inlined_call_operand.vmem [shape: f32[16,256], index: 0, kind: input, shape index: {}]   ;;  %s1434_s1 = inlined_call_operand.hbm [shape: bf16[256,256], index: 1, kind: input, shape index: {}]   ;;  %s1435_s2 = inlined_call_operand.hbm [shape: f32[3,256], index: 2, kind: input, shape index: {}]   ;;  %s1436_s3 = inlined_call_operand.hbm [shape: f32[16,256], index: 3, kind: input, shape index: {}]   ;;  %s1437_s4 = inlined_call_operand.hbm [shape: f32[16,256], index: 4, kind: output, shape index: {}]  }
   0x1   :  { %1451 = sst [smem:[#allocation29_spill]] %s1433_s0 }
   0x2   :  { %1452 = sst [smem:[#allocation30_spill]] %s1435_s2 }
   0x3   :  { %1453 = sst [smem:[#allocation31_spill]] %s1437_s4 }
   0x4   :  { %9 = vsyncpa [#allocation5], 0 }
   0x5   :  { %11 = vsyncpa [#allocation5 + $0x1], 0 }
   0x6   :  { %12 = vsyncpa [#allocation8], 0 }
   0x7   :  { %14 = vsyncpa [#allocation8 + $0x1], 0 }
   0x8   :  { %15 = vsyncpa [#allocation6], 0 }
   0x9   :  { %17 = vsyncpa [#allocation6 + $0x1], 0  ;;  %s1145_s15 = smov 0   ;;  %s1147_s16 = smov 0  }
   0xa   :  { %s1149_s17 = smov 0   ;;  %s1151_s18 = smov 0  }
   0xb   :  { %s1153_s19 = smov 0   ;;  %s1155_s20 = smov 0  }
   0xc   :  { %s1157_s21 = smov 0   ;;  %s1159_s22 = smov 0  }
   0xd   :  { %s1161_s23 = smov 0   ;;  %s1163_s24 = smov 0  }
   0xe   :  { %s1165_s25 = smov 0   ;;  %s1167_s26 = smov 0  }
   0xf   :  { %s1169_s27 = smov 0  }
  0x10 LB: > { %1454 = sst [smem:[#allocation14_spill]] %s1061_s15  ;;  %s1211_s28 = sadd.s32 4294967295, %s1109_s27   ;;  %s1109_s27 = sphi %s1169_s27, %s23_s27   ;;  %s1105_s26 = sphi %s1167_s26, %s1502_s26   ;;  %s1101_s25 = sphi %s1165_s25, %s1495_s25   ;;  %s1097_s24 = sphi %s1163_s24, %s1501_s24   ;;  %s1093_s23 = sphi %s1161_s23, %s1494_s23   ;;  %s1089_s22 = sphi %s1159_s22, %s1493_s22   ;;  %s1085_s21 = sphi %s1157_s21, %s1492_s21   ;;  %s1081_s20 = sphi %s1155_s20, %s1491_s20   ;;  %s1077_s19 = sphi %s1153_s19, %s1500_s19   ;;  %s1073_s18 = sphi %s1151_s18, %s1499_s18   ;;  %s1069_s17 = sphi %s1149_s17, %s1489_s17   ;;  %s1065_s16 = sphi %s1147_s16, %s1498_s16   ;;  %s1061_s15 = sphi %s1145_s15, %s1497_s15  }
  0x11   : > { %1455 = sst [smem:[#allocation15_spill]] %s1069_s17  ;;  %s32_s30 = sadd.s32 1, %s1101_s25 }
  0x12   : > { %1456 = sst [smem:[#allocation16_spill]] %s1081_s20  ;;  %s35_s5 = sadd.s32 1, %s1105_s26 }
  0x13   : > { %1457 = sst [smem:[#allocation17_spill]] %s1089_s22  ;;  %p33_p0 = scmp.ge.s32.totalorder %s32_s30, 2 }
  0x14   : > { %1458 = sst [smem:[#allocation18_spill]] %s1093_s23  ;;  %s42_s6 = sadd.s32 1, %s1089_s22 }
  0x15   : > { %1459 = sst [smem:[#allocation19_spill]] %s1097_s24  ;;  %p49_p1 = scmp.ne.s32.totalorder %s1089_s22, %s1085_s21 }
  0x16   : > { %1460 = sst [smem:[#allocation20_spill]] %s1101_s25  ;;  %p50_p2 = scmp.eq.s32.totalorder %s1109_s27, 0 }
  0x17   : > { %s1504_s30 = smov (%p33_p0, %s32_s30), 0  ;;  %s1506_s5 = smov (!%p33_p0, %s35_s5), %s1105_s26 }
  0x18   : > { %1461 = sst [smem:[#allocation21_spill]] %s1504_s30  ;;  %s39_s7 = ssub.s32 %s1101_s25, %s1504_s30 }
  0x19   : > { %p1227_p3 = por %p50_p2, %p49_p1  ;;  %p37_p4 = scmp.ge.s32.totalorder %s1506_s5, 2 }
  0x1a   : > { %p40_p5 = scmp.eq.s32.totalorder %s39_s7, 0  ;;  %s70_s9 = sadd.s32 1, %s1081_s20 }
  0x1b   : > { %p77_p6 = scmp.ne.s32.totalorder %s1081_s20, %s1077_s19  ;;  %s1508_s5 = smov (%p37_p4, %s1506_s5), 0 }
  0x1c   : > { %1463 = sst [smem:[#allocation22_spill]] %s1508_s5  ;;  %s66_s11 = ssub.s32 %s1105_s26, %s1508_s5 }
  0x1d   : > { %s1237_s10 = scalar_select %p40_p5, %s1089_s22, %s42_s6  }
  0x1e   : > { %p1243_p7 = por %p77_p6, %p50_p2  ;;  %s67_s13 = sor.u32 %s66_s11, %s39_s7 }
  0x1f   : > { %1464 = sst [smem:[#allocation23_spill]] %s1237_s10  ;;  %p83_p8 = scmp.ne.s32.totalorder %s1077_s19, %s1073_s18 }
  0x20   : > { %p68_p9 = scmp.eq.s32.totalorder %s67_s13, 0  ;;  %p84_p10 = scmp.eq.s32.totalorder %s1211_s28, 0 }
  0x21   : > { %p94_p11 = scmp.eq.s32.totalorder %s66_s11, 0  ;;  %s96_s14 = sadd.s32 1, %s1069_s17 }
  0x22   : > { %s1252_s29 = scalar_select %p68_p9, %s1081_s20, %s70_s9  }
  0x23   : > { %p1254_p12 = por %p84_p10, %p83_p8  ;;  %p103_p13 = scmp.ne.s32.totalorder %s1069_s17, %s1065_s16 }
  0x24   : > { %1466 = sst [smem:[#allocation24_spill]] %s1252_s29  ;;  %p109_p1 = scmp.ne.s32.totalorder %s1065_s16, %s1061_s15 }
  0x25   : > { %s1261_s6 = scalar_select %p94_p11, %s1069_s17, %s96_s14  }
  0x26   : > { %p1265_p0 = por %p103_p13, %p50_p2  ;;  %p159_p4 = scmp.eq.s32.totalorder %s1211_s28, 3 }
  0x27   : > { %1468 = sst [smem:[#allocation25_spill]] %s1261_s6  ;;  %s1470_s18 = sadd.s32 4294967294, %s1109_s27  }
  0x28   : > { %p165_p5 = scmp.eq.s32.totalorder %s1470_s18, 3  ;;  %p1274_p6 = por %p109_p1, %p84_p10 }
  0x29   : > { %p1278_p8 = por %p159_p4, %p103_p13  ;;  %p691_p2 = scmp.ge.s32.totalorder %s1109_s27, 4 }
  0x2a   : > { %s1471_s7 = scalar_select %p1274_p6, 1, 0 }
  0x2b   : > { %s1473_s9 = scalar_select %p1278_p8, 1, 0 }
  0x2c   : > { %1472 = sst [smem:[#allocation26_spill]] %s1471_s7  ;;  %p1282_p9 = por %p165_p5, %p109_p1 }
  0x2d   : > { %1474 = sst [smem:[#allocation27_spill]] %s1473_s9  ;;  %181 = sbr.rel (%p691_p2) target bundleno = 81 (0x51), region = 16 }
  0x2e   : > { %s1475_s11 = scalar_select %p1282_p9, 1, 0 }
  0x30   : > { %1476 = sst [smem:[#allocation28_spill]] %s1475_s11 }
  0x32   : > { %184 = sbr.rel (!%p1227_p3) target bundleno = 62 (0x3e), region = 20  ;;  %s186_s13 = sand.u32 (%p1227_p3), 1, %s1089_s22  }
  0x33   : > { %s693_s14 = sshll.u32 (%p1227_p3), %s1101_s25, 3  ;;  %s692_s18 = sshll.u32 (%p1227_p3), %s186_s13, 4 }
  0x34   : > { %s1477_s0 = sld [smem:[#allocation29_spill]] (%p1227_p3)  ;;  %s188_s15 = scalar_lea.vmem (%p1227_p3), [#allocation3], %s692_s18 }
  0x3a   : > { %s190_s6 = scalar_lea.vmem %s1477_s0, %s693_s14 }
  0x3b   : > { %v221_v0 = vld [vmem:[%s190_s6] sm:$0xff]  ;;  %v223_v1 = vld [vmem:[%s190_s6 + $0x10] sm:$0xff] }
  0x3c   : > { %222 = vst [vmem:[%s188_s15] sm:$0xff] %v221_v0 }
  0x3d   : > { %224 = vst [vmem:[%s188_s15 + $0x8] sm:$0xff] %v223_v1 }
  0x3e PF: > { %s255_s8 = sand.u32 1, %s1109_s27   ;;  %s257_s11 = sand.u32 1, %s1069_s17  }
  0x3f   : > { %s698_s22 = sshll.u32 %s257_s11, 2  ;;  %s699_s13 = sshll.u32 %s1105_s26, 2 }
  0x40   : > { %s1478_s2 = sld [smem:[#allocation30_spill]]  ;;  %s259_s10 = scalar_lea.vmem [#allocation7], %s698_s22 }
  0x41   : > { %s267_s6 = sshll.u32 %s259_s10, 4  ;;  %s700_s15 = sshll.u32 %s257_s11, 4  ;;  %s268_s6 = int_to_ptr.vmem [resolvable:$true] %s267_s6 }
  0x42   : > { %s1300_s18 = scalar_lea.sflag [#allocation8], %s255_s8  ;;  %s231_s0 = sand.u32 1, %s1081_s20  }
  0x43   : > { %s278_s17 = scalar_lea.vmem [#allocation9], %s700_s15  ;;  %s694_s4 = sshll.u32 %s231_s0, 6 }
  0x44   : > { %s285_s24 = sshll.u32 %s278_s17, 4  ;;  %s746_s9 = sshll.u32 %s1101_s25, 5  ;;  %s286_s24 = int_to_ptr.vmem [resolvable:$true] %s285_s24 }
  0x45   : > { %s235_s22 = scalar_lea.vmem [#allocation4], %s694_s4  ;;  %s1111_s17 = smov 128  }
  0x46   : > { %s263_s29 = scalar_lea.hbm %s1478_s2, %s699_s13  ;;  %s240_s13 = sadd.s32 %s1105_s26, %s746_s9 }
  0x47   : > { %s265_s14 = sshll.u32 %s263_s29, 4  ;;  %s245_s10 = sshll.u32 %s235_s22, 4  ;;  %s266_s14 = int_to_ptr.hbm [resolvable:$true] %s265_s14  ;;  %s246_s10 = int_to_ptr.vmem [resolvable:$true] %s245_s10 }
  0x48   : > { %756 = dma.hbm_to_vmem [thread:$0]  (%p1265_p0), %s266_s14, 64, %s268_s6, %s1300_s18  }
  0x49   : > { %s697_s29 = sshll.u32 %s240_s13, 2  ;;  %s232_s14 = scalar_lea.sflag [#allocation5], %s231_s0 }
  0x4a   : > { %s242_s2 = scalar_lea.hbm %s1434_s1, %s697_s29  ;;  %s1112_s15 = smov 64  }
  0x4b   : > { %s243_s6 = sshll.u32 %s242_s2, 4  ;;  %s1113_s20 = smov 4   ;;  %s244_s6 = int_to_ptr.hbm [resolvable:$true] %s243_s6 }
  0x4c   : > { %755 = dma.hbm_to_vmem [thread:$0]  (%p1243_p7), %s244_s6, 1024, %s246_s10, %s232_s14, %s1111_s17, %s1112_s15, %s1113_s20  }
  0x4d   : > { %s701_s25 = sshll.u32 %s1105_s26, 3  ;;  %s1114_s23 = smov 256  }
  0x4e   : > { %s282_s13 = scalar_lea.hbm %s1436_s3, %s701_s25  ;;  %s1115_s7 = smov 8  }
  0x4f   : > { %s283_s22 = sshll.u32 %s282_s13, 4  ;;  %s284_s22 = int_to_ptr.hbm [resolvable:$true] %s283_s22 }
  0x50   : > { %757 = dma.hbm_to_vmem [thread:$0]  (%p1265_p0), %s284_s22, 256, %s286_s24, %s1300_s18, %s1114_s23, %s1111_s17, %s1115_s7  }
  0x51 PF: > { %p702_p3 = scmp.ge.s32.totalorder %s1109_s27, 1  ;;  %p293_p10 = scmp.lt.s32.totalorder %s1109_s27, 5 }
  0x53   : > { %p294_p11 = pnand %p702_p3, %p293_p10 }
  0x54   : > { %s300_s0 = sand.u32 (!%p294_p11), 1, %s1085_s21   ;;  %s306_s2 = sand.u32 (!%p294_p11), 1, %s1077_s19  }
  0x55   : > { %297 = sbr.rel (%p294_p11) target bundleno = 372 (0x174), region = 70  ;;  %s1324_s20 = sshll.u32 (!%p294_p11), %s300_s0, 4 }
  0x56   : > { %s704_s25 = sshll.u32 (!%p294_p11), %s306_s2, 6  ;;  %s302_s12 = scalar_lea.vmem (!%p294_p11), [#allocation3], %s1324_s20 }
  0x57   : > { %s307_s10 = scalar_lea.sflag (!%p294_p11), [#allocation5], %s306_s2  ;;  %s1327_s5 = scalar_lea.vmem (!%p294_p11), [#allocation4], %s704_s25 }
  0x5a   : > { %1048 = dma.done.wait (%p1254_p12), %s307_s10, 1024  }
  0x5b   : > { %1050 = vsyncadd (%p1254_p12), %s307_s10, 4294966272  ;;  %s316_s24 = sand.u32 1, %s1211_s28   ;;  %s1335_s7 = sand.u32 1, %s1065_s16  }
  0x5c   : > { %s705_s21 = sshll.u32 %s1335_s7, 2  ;;  %s317_s18 = scalar_lea.sflag [#allocation8], %s316_s24 }
  0x5d   : > { %s1338_s29 = scalar_lea.vmem [#allocation7], %s705_s21 }
  0x5e   : > { %1052 = dma.done.wait (%p1274_p6), %s317_s18, 320  }
  0x5f   : > { %1054 = vsyncadd (%p1274_p6), %s317_s18, 4294966976  ;;  %s706_s11 = sshll.u32 %s1335_s7, 4  ;;  %s1480_s6 = sld [smem:[#allocation18_spill]] }
  0x60   : > { %s1345_s30 = scalar_lea.vmem [#allocation9], %s706_s11  ;;  %s1347_s8 = scalar_lea.vmem [#allocation10], %s706_s11 }
  0x65   : > { %p708_p7 = scmp.ne.s32.totalorder %s1480_s6, 0 }
  0x67   : > { %374 = sbr.rel (%p708_p7) target bundleno = 111 (0x6f), region = 90 }
  0x6c   : > { %v1116_v2 = vmov 0.0  }
  0x6d   : > { %375 = vst [vmem:[#allocation2] sm:$0xff] %v1116_v2 }
  0x6e   : > { %376 = vst [vmem:[#allocation2 + $0x8] sm:$0xff] %v1116_v2 }
  0x6f PF: > { %v754_v3 = vld [vmem:[%s1327_s5 + $0x38] sm:$0xff]  ;;  %v753_v4 = vld [vmem:[%s1327_s5 + $0x30] sm:$0xff]  ;;  %v752_v5 = vld [vmem:[%s1327_s5 + $0x28] sm:$0xff]  ;;  %s1481_s28 = sld [smem:[#allocation18_spill]] }
  0x70   : > { %446 = vmatpush.bf16.msra.mxu0 %v754_v3  ;;  %v751_v6 = vld [vmem:[%s1327_s5 + $0x20] sm:$0xff]  ;;  %v750_v7 = vld [vmem:[%s1327_s5 + $0x18] sm:$0xff]  ;;  %v749_v8 = vld [vmem:[%s1327_s5 + $0x10] sm:$0xff] }
  0x71   : > { %v748_v9 = vld [vmem:[%s1327_s5 + $0x8] sm:$0xff]  ;;  %v747_v10 = vld [vmem:[%s1327_s5] sm:$0xff] }
  0x72   : > { %v377_v11 = vld [vmem:[%s302_s12] sm:$0xff]  ;;  %v378_v12 = vld [vmem:[%s302_s12 + $0x8] sm:$0xff] }
  0x73   : > { %v379_v13 = vpack.c.bf16 %v378_v12, %v377_v11 }
  0x74   : > { %447 = vmatpush.bf16.msra.mxu0 %v753_v4  ;;  %v380_v14 = vld [vmem:[#allocation2] sm:$0xff] }
  0x75   : > { %v381_v17 = vld [vmem:[#allocation2 + $0x8] sm:$0xff]  ;;  %p741_p12 = scmp.ne.s32.totalorder %s1481_s28, 1 }
  0x78   : > { %448 = vmatpush.bf16.msra.mxu0 %v752_v5 }
  0x7c   : > { %449 = vmatpush.bf16.msra.mxu0 %v751_v6 }
  0x80   : > { %450 = vmatpush.bf16.msra.mxu0 %v750_v7 }
  0x84   : > { %451 = vmatpush.bf16.msra.mxu0 %v749_v8 }
  0x88   : > { %452 = vmatpush.bf16.msra.mxu0 %v748_v9 }
  0x8c   : > { %453 = vmatpush.bf16.msra.mxu0 %v747_v10 }
  0x8f   : > { %454 = vmatmul.bf16.vlgmr.msra.gmra.mxu0 %v379_v13 }
 0x10c   : > { %v455_v15 = vpop.f32.mrf.mxu0 }
 0x10d   : > { %v460_v16 = vadd.f32 %v455_v15, %v380_v14 }
 0x10f   : > { %462 = vst [vmem:[#allocation2] sm:$0xff] %v460_v16 }
 0x113   : > { %467 = sbr.rel (%p741_p12) target bundleno = 349 (0x15d), region = 94 }
 0x114   : > { %v457_v18 = vpop.f32.mrf.mxu0 }
 0x115   : > { %v461_v19 = vadd.f32 %v457_v18, %v381_v17 }
 0x117   : > { %463 = vst [vmem:[#allocation2 + $0x8] sm:$0xff] %v461_v19 }
 0x118   : > { %v468_v20 = vld [vmem:[%s1338_s29] sm:$0x7]  ;;  %v469_v21 = vld [vmem:[#allocation2] sm:$0xff]  ;;  %v520_v1 = vld [vmem:[%s1345_s30] sm:$0xff] }
 0x119   : > { %v471_v23 = vperm.slane %v468_v20, 0  ;;  %v521_v2 = vld [vmem:[%s1345_s30 + $0x8] sm:$0xff] }
 0x11b   : > { %v472_v24 = vadd.f32 %v471_v23, %v469_v21 }
 0x11d   : > { %v474_v26 = vmax.f32 %v472_v24, 0.0 }
 0x11e   : > { %v470_v22 = vld [vmem:[#allocation2 + $0x8] sm:$0xff] }
 0x11f   : > { %v473_v25 = vadd.f32 %v471_v23, %v470_v22  ;;  %v484_v29 = vmul.f32 %v474_v26, %v474_v26 }
 0x121   : > { %v475_v27 = vmax.f32 %v473_v25, 0.0 }
 0x123   : > { %v476_v28 = vadd.f32 %v475_v27, %v474_v26  ;;  %v485_v30 = vmul.f32 %v475_v27, %v475_v27 }
 0x125   : > { %v477_v31 = vrot.slane %v476_v28, 4  ;;  %v486_v32 = vadd.f32 %v485_v30, %v484_v29 }
 0x127   : > { %v478_v33 = vadd.f32 %v477_v31, %v476_v28  ;;  %v487_v34 = vrot.slane %v486_v32, 4 }
 0x129   : > { %v479_v35 = vrot.slane %v478_v33, 2  ;;  %v488_v36 = vadd.f32 %v487_v34, %v486_v32 }
 0x12b   : > { %v480_v37 = vadd.f32 %v479_v35, %v478_v33  ;;  %v489_v38 = vrot.slane %v488_v36, 2 }
 0x12d   : > { %v481_v39 = vrot.slane %v480_v37, 1  ;;  %v490_v40 = vadd.f32 %v489_v38, %v488_v36 }
 0x12f   : > { %v482_v41 = vadd.f32 %v481_v39, %v480_v37  ;;  %v491_v42 = vrot.slane %v490_v40, 1 }
 0x131   : > { %v483_v43 = vmul.f32 0.0625, %v482_v41  ;;  %v492_v44 = vadd.f32 %v491_v42, %v490_v40 }
 0x133   : > { %v493_v45 = vmul.f32 0.0625, %v492_v44  ;;  %v494_v46 = vmul.f32 %v483_v43, %v483_v43 }
 0x135   : > { %v495_v47 = vsub.f32 %v493_v45, %v494_v46 }
 0x137   : > { %v496_v48 = vmax.f32 %v495_v47, 0.0 }
 0x139   : > { %v497_v49 = vadd.f32 1e-05, %v496_v48 }
 0x13b   : > { %881 = vrsqrt.f32 %v497_v49  ;;  %vm504_vm0 = vweird.f32 %v497_v49 }
 0x141   : > { %v882_v50 = vpop.eup %881 }
 0x142   : > { %v499_v51 = vmul.f32 %v882_v50, %v497_v49  ;;  %vm505_vm1 = vweird.f32 %v882_v50 }
 0x143   : > { %vm506_vm2 = vmor %vm504_vm0, %vm505_vm1 }
 0x144   : > { %v500_v52 = vmul.f32 %v882_v50, %v499_v51 }
 0x146   : > { %v501_v53 = vmul.f32 0.5, %v500_v52 }
 0x148   : > { %v502_v54 = vsub.f32 1.5, %v501_v53 }
 0x14a   : > { %v503_v55 = vmul.f32 %v882_v50, %v502_v54 }
 0x14c   : > { %v507_v56 = vsel %vm506_vm2, %v882_v50, %v503_v55 }
 0x14d   : > { %v508_v57 = vmul.f32 %v507_v56, %v468_v20 }
 0x14f   : > { %v509_v58 = vmul.f32 %v508_v57, %v483_v43  ;;  %v514_v59 = vperm.slane %v508_v57, 1 }
 0x151   : > { %v511_v60 = vrot.slane %v509_v58, 7  ;;  %v515_v62 = vmul.f32 %v514_v59, %v474_v26  ;;  %v516_v63 = vmul.f32 %v514_v59, %v475_v27 }
 0x153   : > { %v513_v61 = vsub.f32 %v468_v20, %v511_v60 }
 0x155   : > { %v517_v0 = vperm.slane %v513_v61, 2 }
 0x157   : > { %v518_v3 = vadd.f32 %v517_v0, %v515_v62  ;;  %v519_v4 = vadd.f32 %v517_v0, %v516_v63 }
 0x159   : > { %v522_v5 = vadd.f32 %v520_v1, %v518_v3  ;;  %v523_v6 = vadd.f32 %v521_v2, %v519_v4 }
 0x15b   : > { %524 = vst [vmem:[%s1347_s8] sm:$0xff] %v522_v5 }
 0x15c   : > { %525 = vst [vmem:[%s1347_s8 + $0x8] sm:$0xff] %v523_v6 }
 0x15d PF: > { %s1482_s14 = sld [smem:[#allocation19_spill]]  ;;  %s538_s0 = sshll.u32 %s1347_s8, 4  ;;  %s539_s0 = int_to_ptr.vmem [resolvable:$true] %s538_s0 }
 0x15e   : > { %s1484_s13 = sld [smem:[#allocation31_spill]]  ;;  %s527_s20 = scalar_lea.sflag [#allocation6], %s1335_s7 }
 0x163   : > { %s743_s15 = sshll.u32 %s1482_s14, 3 }
 0x164   : > { %s537_s22 = scalar_lea.hbm %s1484_s13, %s743_s15  ;;  %s987_s23 = scalar_lea.hbm %s1484_s13, 32 }
 0x165   : > { %s540_s2 = sshll.u32 %s537_s22, 4  ;;  %s541_s2 = int_to_ptr.hbm [resolvable:$true] %s540_s2 }
 0x166   : > { %s981_s25 = sshra.s32 %s541_s2, 4  ;;  %s982_s25 = int_to_ptr.hbm [resolvable:$true] %s981_s25 }
 0x167   : > { %s983_s12 = scalar_lea.hbm %s982_s25, 16  ;;  %p988_p4 = scmp.lt.s32.totalorder %s982_s25, %s1484_s13 }
 0x168   : > { %p984_p13 = scmp.ne.s32.totalorder %s982_s25, %s983_s12  ;;  %p989_p5 = scmp.lt.s32.totalorder %s987_s23, %s983_s12 }
 0x16a   : > { %p985_p0 = pnand %p984_p13, %p1278_p8  ;;  %p990_p6 = por %p989_p5, %p988_p4 }
 0x16c   : > { %p986_p1 = pneg %p985_p0 }
 0x16e   : > { %p991_p2 = pnand %p990_p6, %p986_p1 }
 0x170   : > { %994 = shalt.err (!%p991_p2)
}
 0x171   : > { %s1117_s7 = smov 128   ;;  %s1118_s18 = smov 256  }
 0x172   : > { %s1119_s29 = smov 8  }
 0x173   : > { %761 = dma.vmem_to_hbm [thread:$0]  (%p1278_p8), %s539_s0, 256, %s541_s2, %s527_s20, %s1117_s7, %s1118_s18, %s1119_s29  }
 0x174 PF: > { %s1485_s11 = sld [smem:[#allocation14_spill]]  ;;  %p767_p3 = scmp.ge.s32.totalorder %s1109_s27, 2 }
 0x176   : > { %p764_p10 = pnand %p767_p3, %p1282_p9 }
 0x178   : > { %p765_p11 = pneg %p764_p10 }
 0x17a   : > { %s555_s8 = sand.u32 1, %s1485_s11  }
 0x17b   : > { %s556_s6 = scalar_lea.sflag [#allocation6], %s555_s8 }
 0x17c   : > { %1056 = dma.done.wait (%p765_p11), %s556_s6, 256  }
 0x17d   : > { %1058 = vsyncadd (%p765_p11), %s556_s6, 4294967040  ;;  %s23_s27 = sadd.s32 1, %s1109_s27   ;;  %s1488_s14 = sld [smem:[#allocation15_spill]] }
 0x17e   : > { %p1389_p7 = scmp.ge.s32.totalorder %s23_s27, 6   ;;  %s1489_s17 = sld [smem:[#allocation25_spill]] }
 0x17f   : > { %s1490_s9 = sld [smem:[#allocation16_spill]]  ;;  %s1497_s15 = smov %s1065_s16 }
 0x180   : > { %s1491_s20 = sld [smem:[#allocation24_spill]]  ;;  %s1499_s18 = smov %s1077_s19 }
 0x181   : > { %s1492_s21 = sld [smem:[#allocation17_spill]]  ;;  %s1501_s24 = smov %s1105_s26 }
 0x182   : > { %s1493_s22 = sld [smem:[#allocation23_spill]] }
 0x183   : > { %s1494_s23 = sld [smem:[#allocation20_spill]]  ;;  %s1498_s16 = smov %s1488_s14 }
 0x184   : > { %s1495_s25 = sld [smem:[#allocation21_spill]] }
 0x185   : > { %s1496_s4 = sld [smem:[#allocation22_spill]]  ;;  %s1500_s19 = smov %s1490_s9 }
 0x187   :  { %22 = sbr.rel (!%p1389_p7) target bundleno = 16 (0x10), region = 159 }
 0x18b   : > { %s1502_s26 = smov %s1496_s4 }
 0x18c   :  { %562 = vsyncpa [#allocation5], 1 }
 0x18d   :  { %564 = vsyncpa [#allocation5 + $0x1], 1 }
 0x18e   :  { %565 = vsyncpa [#allocation8], 1 }
 0x18f   :  { %567 = vsyncpa [#allocation8 + $0x1], 1 }
 0x190   :  { %568 = vsyncpa [#allocation6], 1 }
 0x191   :  { %570 = vsyncpa [#allocation6 + $0x1], 1 }

// kernel: residual_block.2
= control target key start
LH: loop header
LB: loop body
LE: loop exit
PB: predicated region body
PF: predicated region fallthrough
CT: control target
= control target key end

     0   :  { %s1346_s0 = inlined_call_operand.hbm [shape: f32[16,256], index: 0, kind: input, shape index: {}]   ;;  %s1347_s1 = inlined_call_operand.hbm [shape: bf16[256,256], index: 1, kind: input, shape index: {}]   ;;  %s1348_s2 = inlined_call_operand.hbm [shape: f32[3,256], index: 2, kind: input, shape index: {}]   ;;  %s1349_s3 = inlined_call_operand.vmem [shape: f32[16,256], index: 3, kind: output, shape index: {}]  }
   0x1   :  { %1355 = sst [smem:[#allocation17_spill]] %s1346_s0 }
   0x2   :  { %1356 = sst [smem:[#allocation18_spill]] %s1347_s1 }
   0x3   :  { %1357 = sst [smem:[#allocation19_spill]] %s1349_s3 }
   0x4   :  { %8 = vsyncpa [#allocation4], 0 }
   0x5   :  { %10 = vsyncpa [#allocation4 + $0x1], 0 }
   0x6   :  { %11 = vsyncpa [#allocation6], 0 }
   0x7   :  { %13 = vsyncpa [#allocation6 + $0x1], 0  ;;  %s1037_s12 = smov 0   ;;  %s1039_s13 = smov 0  }
   0x8   :  { %s1041_s14 = smov 0   ;;  %s1043_s15 = smov 0  }
   0x9   :  { %s1045_s16 = smov 0   ;;  %s1047_s17 = smov 0  }
   0xa   :  { %s1049_s18 = smov 0   ;;  %s1051_s19 = smov 0  }
   0xb   :  { %s1053_s20 = smov 0   ;;  %s1055_s21 = smov 0  }
   0xc   :  { %s1057_s22 = smov 0   ;;  %s1059_s23 = smov 0  }
   0xd   :  { %s1061_s24 = smov 0   ;;  %s1063_s25 = smov 0  }
   0xe LB: > { %1358 = sst [smem:[#allocation12_spill]] %s989_s20  ;;  %s28_s26 = sadd.s32 1, %s1001_s23  ;;  %s1009_s25 = sphi %s1063_s25, %s19_s25   ;;  %s1005_s24 = sphi %s1061_s24, %s1392_s24   ;;  %s1001_s23 = sphi %s1059_s23, %s1381_s23   ;;  %s997_s22 = sphi %s1057_s22, %s1391_s22   ;;  %s993_s21 = sphi %s1055_s21, %s1380_s21   ;;  %s989_s20 = sphi %s1053_s20, %s1379_s20   ;;  %s985_s19 = sphi %s1051_s19, %s1390_s19   ;;  %s981_s18 = sphi %s1049_s18, %s1389_s18   ;;  %s977_s17 = sphi %s1047_s17, %s1388_s17   ;;  %s973_s16 = sphi %s1045_s16, %s1387_s16   ;;  %s969_s15 = sphi %s1043_s15, %s1386_s15   ;;  %s965_s14 = sphi %s1041_s14, %s1385_s14   ;;  %s961_s13 = sphi %s1039_s13, %s1384_s13   ;;  %s957_s12 = sphi %s1037_s12, %s1383_s12  }
   0xf   : > { %1359 = sst [smem:[#allocation13_spill]] %s1001_s23  ;;  %p1109_p0 = scmp.ge.s32.totalorder %s28_s26, 2 }
  0x10   : > { %p46_p1 = scmp.eq.s32.totalorder %s1009_s25, 0  ;;  %p73_p2 = scmp.ne.s32.totalorder %s977_s17, %s973_s16 }
  0x11   : > { %s1394_s26 = smov (%p1109_p0, %s28_s26), 0  ;;  %p79_p4 = scmp.ne.s32.totalorder %s973_s16, %s969_s15 }
  0x12   : > { %1361 = sst [smem:[#allocation14_spill]] %s1394_s26  ;;  %p1123_p3 = por %p73_p2, %p46_p1 }
  0x13   : > { %s1131_s4 = ssub.s32 %s1001_s23, %s1394_s26  ;;  %p676_p6 = scmp.lt.s32.totalorder %s1009_s25, 4 }
  0x14   : > { %p36_p5 = scmp.eq.s32.totalorder %s1131_s4, 0  ;;  %s176_s5 = sand.u32 1, %s1009_s25  }
  0x15   : > { %s178_s6 = sand.u32 1, %s977_s17   ;;  %s651_s8 = sshll.u32 %s1001_s23, 5 }
  0x16   : > { %s602_s7 = sshll.u32 %s178_s6, 6  ;;  %s185_s9 = sadd.s32 %s1005_s24, %s651_s8 }
  0x17   : > { %s605_s10 = sshll.u32 %s185_s9, 2  ;;  %s180_s11 = scalar_lea.vmem [#allocation5], %s602_s7 }
  0x18   : > { %s190_s29 = sshll.u32 %s180_s11, 4  ;;  %s1363_s1 = sld [smem:[#allocation18_spill]]  ;;  %s191_s29 = int_to_ptr.vmem [resolvable:$true] %s190_s29 }
  0x19   : > { %p670_p7 = pnand %p676_p6, %p1123_p3  ;;  %s1146_s7 = scalar_lea.sflag [#allocation6], %s176_s5 }
  0x1a   : > { %s1351_s8 = smov 128   ;;  %s1012_s9 = smov 64  }
  0x1b   : > { %s1013_s3 = smov 4   ;;  %p608_p8 = scmp.ge.s32.totalorder %s1009_s25, 1 }
  0x1c   : > { %p217_p9 = scmp.lt.s32.totalorder %s1009_s25, 5  ;;  %p45_p11 = scmp.ne.s32.totalorder %s989_s20, %s985_s19 }
  0x1d   : > { %p51_p12 = scmp.ne.s32.totalorder %s985_s19, %s981_s18  ;;  %s155_s5 = sand.u32 1, %s989_s20  }
  0x1e   : > { %s187_s26 = scalar_lea.hbm %s1363_s1, %s605_s10  ;;  %p1152_p10 = pnand %p608_p8, %p217_p9 }
  0x1f   : > { %s188_s6 = sshll.u32 %s187_s26, 4  ;;  %s38_s26 = sadd.s32 1, %s989_s20  ;;  %s189_s6 = int_to_ptr.hbm [resolvable:$true] %s188_s6 }
  0x20   : > { %672 = dma.hbm_to_vmem [thread:$0]  (!%p670_p7), %s189_s6, 1024, %s191_s29, %s1146_s7, %s1351_s8, %s1012_s9, %s1013_s3  }
  0x21   : > { %s1160_s30 = scalar_select %p36_p5, %s989_s20, %s38_s26  }
  0x22   : > { %s601_s10 = sshll.u32 %s1001_s23, 3  ;;  %p47_p13 = por %p46_p1, %p45_p11 }
  0x23   : > { %1365 = sst [smem:[#allocation15_spill]] %s1160_s30  ;;  %s600_s29 = sshll.u32 %s155_s5, 4 }
  0x24   : > { %s1366_s0 = sld [smem:[#allocation17_spill]]  ;;  %s159_s26 = scalar_lea.vmem [#allocation3], %s600_s29 }
  0x25   : > { %s166_s8 = sshll.u32 %s159_s26, 4  ;;  %p667_p2 = pnand %p676_p6, %p47_p13  ;;  %s167_s8 = int_to_ptr.vmem [resolvable:$true] %s166_s8 }
  0x26   : > { %s1014_s11 = smov 256   ;;  %s1015_s6 = smov 8  }
  0x27   : > { %s1368_s1 = sadd.s32 1, %s1005_s24  ;;  %p99_p7 = scmp.ne.s32.totalorder %s965_s14, %s961_s13 }
  0x28   : > { %s1396_s1 = smov (!%p1109_p0, %s1368_s1), %s1005_s24  ;;  %p105_p11 = scmp.ne.s32.totalorder %s961_s13, %s957_s12 }
  0x29   : > { %p33_p5 = scmp.ge.s32.totalorder %s1396_s1, 2  ;;  %p1213_p9 = por %p99_p7, %p46_p1 }
  0x2a   : > { %s163_s9 = scalar_lea.hbm %s1366_s0, %s601_s10  ;;  %s156_s10 = scalar_lea.sflag [#allocation4], %s155_s5 }
  0x2b   : > { %s164_s3 = sshll.u32 %s163_s9, 4  ;;  %s1367_s9 = smov 128   ;;  %s165_s3 = int_to_ptr.hbm [resolvable:$true] %s164_s3 }
  0x2c   : > { %669 = dma.hbm_to_vmem [thread:$0]  (!%p667_p2), %s165_s3, 256, %s167_s8, %s156_s10, %s1014_s11, %s1367_s9, %s1015_s6  }
  0x2d   : > { %s1177_s0 = sadd.s32 4294967295, %s1009_s25   ;;  %s92_s5 = sadd.s32 1, %s965_s14 }
  0x2e   : > { %p52_p3 = scmp.eq.s32.totalorder %s1177_s0, 0  ;;  %s1398_s1 = smov (%p33_p5, %s1396_s1), 0 }
  0x2f   : > { %1371 = sst [smem:[#allocation16_spill]] %s1398_s1  ;;  %s62_s18 = ssub.s32 %s1005_s24, %s1398_s1 }
  0x30   : > { %p1193_p8 = por %p52_p3, %p51_p12  ;;  %p1202_p0 = por %p79_p4, %p52_p3 }
  0x31   : > { %p129_p12 = scmp.eq.s32.totalorder %s1177_s0, 3  ;;  %s63_s3 = sor.u32 %s62_s18, %s1131_s4 }
  0x32   : > { %p90_p13 = scmp.eq.s32.totalorder %s62_s18, 0  ;;  %p64_p4 = scmp.eq.s32.totalorder %s63_s3, 0 }
  0x33   : > { %p1225_p2 = por %p105_p11, %p52_p3  ;;  %s1374_s10 = sadd.s32 1, %s977_s17 }
  0x34   : > { %s1230_s26 = scalar_select %p90_p13, %s965_s14, %s92_s5  }
  0x35   : > { %s1235_s11 = scalar_select %p64_p4, %s977_s17, %s1374_s10  }
  0x36   : > { %p1240_p1 = por %p129_p12, %p99_p7  ;;  %s202_s4 = sand.u32 1, %s965_s14  }
  0x37   : > { %s606_s6 = sshll.u32 %s202_s4, 2  ;;  %s607_s9 = sshll.u32 %s1005_s24, 2 }
  0x38   : > { %s208_s1 = scalar_lea.hbm %s1348_s2, %s607_s9  ;;  %s204_s30 = scalar_lea.vmem [#allocation7], %s606_s6 }
  0x39   : > { %s210_s23 = sshll.u32 %s208_s1, 4  ;;  %s212_s20 = sshll.u32 %s204_s30, 4  ;;  %s211_s23 = int_to_ptr.hbm [resolvable:$true] %s210_s23  ;;  %s213_s20 = int_to_ptr.vmem [resolvable:$true] %s212_s20 }
  0x3a   : > { %p673_p3 = pnand %p676_p6, %p1213_p9  ;;  %221 = sbr.rel (%p1152_p10) target bundleno = 328 (0x148), region = 32 }
  0x3b   : > { %s223_s5 = sand.u32 (!%p1152_p10), 1, %s985_s19  }
  0x3c   : > { %675 = dma.hbm_to_vmem [thread:$0]  (!%p673_p3), %s211_s23, 64, %s213_s20, %s1146_s7  }
  0x3d   : > { %s1257_s10 = sshll.u32 (!%p1152_p10), %s223_s5, 4  ;;  %s224_s4 = scalar_lea.sflag (!%p1152_p10), [#allocation4], %s223_s5 }
  0x3e   : > { %s227_s9 = scalar_lea.vmem (!%p1152_p10), [#allocation3], %s1257_s10 }
  0x3f   : > { %944 = dma.done.wait (%p1193_p8), %s224_s4, 256  }
  0x40   : > { %946 = vsyncadd (%p1193_p8), %s224_s4, 4294967040  ;;  %s233_s1 = sand.u32 1, %s1177_s0   ;;  %s235_s20 = sand.u32 1, %s973_s16  }
  0x41   : > { %s610_s23 = sshll.u32 %s235_s20, 6  ;;  %s234_s7 = scalar_lea.sflag [#allocation6], %s233_s1 }
  0x42   : > { %s237_s27 = scalar_lea.vmem [#allocation5], %s610_s23 }
  0x43   : > { %948 = dma.done.wait (%p1202_p0), %s234_s7, 1024  }
  0x44   : > { %950 = vsyncadd (%p1202_p0), %s234_s7, 4294966272  ;;  %s245_s30 = sand.u32 1, %s961_s13  }
  0x45   : > { %s1271_s29 = sshll.u32 %s245_s30, 2 }
  0x46   : > { %s247_s28 = scalar_lea.vmem [#allocation7], %s1271_s29 }
  0x47   : > { %952 = dma.done.wait (%p1225_p2), %s234_s7, 64  }
  0x48   : > { %954 = vsyncadd (%p1225_p2), %s234_s7, 4294967232  ;;  %s612_s0 = sshll.u32 %s245_s30, 4  ;;  %p613_p6 = scmp.ne.s32.totalorder %s993_s21, 0 }
  0x49   : > { %s1278_s6 = scalar_lea.vmem [#allocation8], %s612_s0 }
  0x4a   : > { %284 = sbr.rel (%p613_p6) target bundleno = 82 (0x52), region = 48 }
  0x4f   : > { %v1016_v0 = vmov 0.0  }
  0x50   : > { %285 = vst [vmem:[#allocation2] sm:$0xff] %v1016_v0 }
  0x51   : > { %286 = vst [vmem:[#allocation2 + $0x8] sm:$0xff] %v1016_v0 }
  0x52 PF: > { %v659_v1 = vld [vmem:[%s237_s27 + $0x38] sm:$0xff]  ;;  %v658_v2 = vld [vmem:[%s237_s27 + $0x30] sm:$0xff]  ;;  %v657_v3 = vld [vmem:[%s237_s27 + $0x28] sm:$0xff]  ;;  %p646_p10 = scmp.ne.s32.totalorder %s993_s21, 1 }
  0x53   : > { %356 = vmatpush.bf16.msra.mxu0 %v659_v1  ;;  %v656_v4 = vld [vmem:[%s237_s27 + $0x20] sm:$0xff]  ;;  %v655_v5 = vld [vmem:[%s237_s27 + $0x18] sm:$0xff]  ;;  %v654_v6 = vld [vmem:[%s237_s27 + $0x10] sm:$0xff] }
  0x54   : > { %v653_v7 = vld [vmem:[%s237_s27 + $0x8] sm:$0xff]  ;;  %v652_v8 = vld [vmem:[%s237_s27] sm:$0xff] }
  0x55   : > { %v287_v9 = vld [vmem:[%s227_s9] sm:$0xff]  ;;  %v288_v10 = vld [vmem:[%s227_s9 + $0x8] sm:$0xff] }
  0x56   : > { %v289_v11 = vpack.c.bf16 %v288_v10, %v287_v9 }
  0x57   : > { %357 = vmatpush.bf16.msra.mxu0 %v658_v2  ;;  %v290_v12 = vld [vmem:[#allocation2] sm:$0xff] }
  0x58   : > { %v291_v15 = vld [vmem:[#allocation2 + $0x8] sm:$0xff] }
  0x5b   : > { %358 = vmatpush.bf16.msra.mxu0 %v657_v3 }
  0x5f   : > { %359 = vmatpush.bf16.msra.mxu0 %v656_v4 }
  0x63   : > { %360 = vmatpush.bf16.msra.mxu0 %v655_v5 }
  0x67   : > { %361 = vmatpush.bf16.msra.mxu0 %v654_v6 }
  0x6b   : > { %362 = vmatpush.bf16.msra.mxu0 %v653_v7 }
  0x6f   : > { %363 = vmatpush.bf16.msra.mxu0 %v652_v8 }
  0x72   : > { %364 = vmatmul.bf16.vlgmr.msra.gmra.mxu0 %v289_v11 }
  0xef   : > { %v365_v13 = vpop.f32.mrf.mxu0 }
  0xf0   : > { %v370_v14 = vadd.f32 %v365_v13, %v290_v12 }
  0xf2   : > { %372 = vst [vmem:[#allocation2] sm:$0xff] %v370_v14 }
  0xf6   : > { %377 = sbr.rel (%p646_p10) target bundleno = 318 (0x13e), region = 52 }
  0xf7   : > { %v367_v16 = vpop.f32.mrf.mxu0 }
  0xf8   : > { %v371_v17 = vadd.f32 %v367_v16, %v291_v15 }
  0xfa   : > { %373 = vst [vmem:[#allocation2 + $0x8] sm:$0xff] %v371_v17 }
  0xfb   : > { %v378_v18 = vld [vmem:[%s247_s28] sm:$0x7]  ;;  %v379_v19 = vld [vmem:[#allocation2] sm:$0xff] }
  0xfc   : > { %v381_v21 = vperm.slane %v378_v18, 0 }
  0xfe   : > { %v382_v22 = vadd.f32 %v381_v21, %v379_v19 }
 0x100   : > { %v384_v24 = vmax.f32 %v382_v22, 0.0 }
 0x101   : > { %v380_v20 = vld [vmem:[#allocation2 + $0x8] sm:$0xff] }
 0x102   : > { %v383_v23 = vadd.f32 %v381_v21, %v380_v20  ;;  %v394_v27 = vmul.f32 %v384_v24, %v384_v24 }
 0x104   : > { %v385_v25 = vmax.f32 %v383_v23, 0.0 }
 0x106   : > { %v386_v26 = vadd.f32 %v385_v25, %v384_v24  ;;  %v395_v28 = vmul.f32 %v385_v25, %v385_v25 }
 0x108   : > { %v387_v29 = vrot.slane %v386_v26, 4  ;;  %v396_v30 = vadd.f32 %v395_v28, %v394_v27 }
 0x10a   : > { %v388_v31 = vadd.f32 %v387_v29, %v386_v26  ;;  %v397_v32 = vrot.slane %v396_v30, 4 }
 0x10c   : > { %v389_v33 = vrot.slane %v388_v31, 2  ;;  %v398_v34 = vadd.f32 %v397_v32, %v396_v30 }
 0x10e   : > { %v390_v35 = vadd.f32 %v389_v33, %v388_v31  ;;  %v399_v36 = vrot.slane %v398_v34, 2 }
 0x110   : > { %v391_v37 = vrot.slane %v390_v35, 1  ;;  %v400_v38 = vadd.f32 %v399_v36, %v398_v34 }
 0x112   : > { %v392_v39 = vadd.f32 %v391_v37, %v390_v35  ;;  %v401_v40 = vrot.slane %v400_v38, 1 }
 0x114   : > { %v393_v41 = vmul.f32 0.0625, %v392_v39  ;;  %v402_v42 = vadd.f32 %v401_v40, %v400_v38 }
 0x116   : > { %v403_v43 = vmul.f32 0.0625, %v402_v42  ;;  %v404_v44 = vmul.f32 %v393_v41, %v393_v41 }
 0x118   : > { %v405_v45 = vsub.f32 %v403_v43, %v404_v44 }
 0x11a   : > { %v406_v46 = vmax.f32 %v405_v45, 0.0 }
 0x11c   : > { %v407_v47 = vadd.f32 1e-05, %v406_v46 }
 0x11e   : > { %795 = vrsqrt.f32 %v407_v47  ;;  %vm414_vm0 = vweird.f32 %v407_v47 }
 0x124   : > { %v796_v48 = vpop.eup %795 }
 0x125   : > { %v409_v49 = vmul.f32 %v796_v48, %v407_v47  ;;  %vm415_vm1 = vweird.f32 %v796_v48 }
 0x126   : > { %vm416_vm2 = vmor %vm414_vm0, %vm415_vm1 }
 0x127   : > { %v410_v50 = vmul.f32 %v796_v48, %v409_v49 }
 0x129   : > { %v411_v51 = vmul.f32 0.5, %v410_v50 }
 0x12b   : > { %v412_v52 = vsub.f32 1.5, %v411_v51 }
 0x12d   : > { %v413_v53 = vmul.f32 %v796_v48, %v412_v52 }
 0x12f   : > { %v417_v54 = vsel %vm416_vm2, %v796_v48, %v413_v53 }
 0x130   : > { %v418_v55 = vmul.f32 %v417_v54, %v378_v18 }
 0x132   : > { %v419_v56 = vmul.f32 %v418_v55, %v393_v41  ;;  %v424_v57 = vperm.slane %v418_v55, 1 }
 0x134   : > { %v421_v58 = vrot.slane %v419_v56, 7  ;;  %v425_v60 = vmul.f32 %v424_v57, %v384_v24  ;;  %v426_v61 = vmul.f32 %v424_v57, %v385_v25 }
 0x136   : > { %v423_v59 = vsub.f32 %v378_v18, %v421_v58 }
 0x138   : > { %v427_v62 = vperm.slane %v423_v59, 2 }
 0x13a   : > { %v428_v63 = vadd.f32 %v427_v62, %v425_v60  ;;  %v429_v0 = vadd.f32 %v427_v62, %v426_v61 }
 0x13c   : > { %430 = vst [vmem:[%s1278_s6] sm:$0xff] %v428_v63 }
 0x13d   : > { %431 = vst [vmem:[%s1278_s6 + $0x8] sm:$0xff] %v429_v0 }
 0x13e PF: > { %438 = sbr.rel (!%p1240_p1) target bundleno = 328 (0x148), region = 56  ;;  %s648_s21 = sshll.u32 (%p1240_p1), %s997_s22, 3 }
 0x13f   : > { %s1376_s18 = sld [smem:[#allocation19_spill]] (%p1240_p1) }
 0x143   : > { %v471_v1 = vld [vmem:[%s1278_s6] sm:$0xff] }
 0x144   : > { %v473_v2 = vld [vmem:[%s1278_s6 + $0x8] sm:$0xff] }
 0x145   : > { %s440_s3 = scalar_lea.vmem %s1376_s18, %s648_s21 }
 0x146   : > { %472 = vst [vmem:[%s440_s3] sm:$0xff] %v471_v1 }
 0x147   : > { %474 = vst [vmem:[%s440_s3 + $0x10] sm:$0xff] %v473_v2 }
 0x148 PF: > { %s19_s25 = sadd.s32 1, %s1009_s25   ;;  %s1378_s22 = sld [smem:[#allocation12_spill]] }
 0x149   : > { %p1299_p5 = scmp.ge.s32.totalorder %s19_s25, 6   ;;  %s1379_s20 = sld [smem:[#allocation15_spill]] }
 0x14a   : > { %s1380_s21 = sld [smem:[#allocation13_spill]]  ;;  %s1383_s12 = smov %s961_s13 }
 0x14b   : > { %s1381_s23 = sld [smem:[#allocation14_spill]]  ;;  %s1384_s13 = smov %s965_s14 }
 0x14c   : > { %s1382_s10 = sld [smem:[#allocation16_spill]]  ;;  %s1385_s14 = smov %s1230_s26 }
 0x14d   : > { %s1386_s15 = smov %s973_s16  ;;  %s1387_s16 = smov %s977_s17 }
 0x14e   : > { %s1388_s17 = smov %s1235_s11  ;;  %s1389_s18 = smov %s985_s19 }
 0x14f   : > { %s1390_s19 = smov %s1378_s22  ;;  %s1391_s22 = smov %s1005_s24 }
 0x150   :  { %18 = sbr.rel (!%p1299_p5) target bundleno = 14 (0xe), region = 142 }
 0x152   : > { %s1392_s24 = smov %s1382_s10 }
 0x155   :  { %490 = vsyncpa [#allocation4], 1 }
 0x156   :  { %492 = vsyncpa [#allocation4 + $0x1], 1 }
 0x157   :  { %493 = vsyncpa [#allocation6], 1 }
 0x158   :  { %495 = vsyncpa [#allocation6 + $0x1], 1 }

</bundles_post_ra>
